<compile_context>
chip_gen: v7x
topology: tpu7x:2x2x1
jax: 0.10.0
libtpu: 0.0.40
codegen_flags: <defaults>
</compile_context>

<pallas_src>
import math

import jax
import jax.numpy as jnp
from jax.experimental import pallas as pl
from jax.experimental.pallas import tpu as pltpu

_LANE = 128
_SUBLANE = 8


def _round_up(n, m):
    return -(-n // m) * m


def _controller_kernel(x_ref, lr_ref, w1_ref, b1_ref, w2_ref, b2_ref, o_ref,
                       xcat_ref):
    """sigmoid(fc2(sigmoid(fc1(cat(x, last_read))))) for one (padded) batch tile."""
    dx = x_ref.shape[-1]

    # Fused concat: both halves written into one VMEM scratch -> fc1 is a
    # single MXU pass (the stores land in otherwise-idle store/VPU slots).
    xcat_ref[:, :dx] = x_ref[...]
    xcat_ref[:, dx:] = lr_ref[...]

    # fc1 + sigmoid.  Bias-add / transcendental kept in f32 (v5e: no bf16 VPU/EUP).
    h = jnp.dot(xcat_ref[...], w1_ref[...], preferred_element_type=jnp.float32)
    h = jax.nn.sigmoid(h + b1_ref[...].astype(jnp.float32))

    # Downcast only right before the fc2 dot and only for genuinely lower-
    # precision weights (use bf16/fp8 on v7x; its MXU has no int8 path).
    if w2_ref.dtype != h.dtype:
        h = h.astype(w2_ref.dtype)

    # fc2 + sigmoid.  w2/b2 are lane-padded to a multiple of 128, so this is a
    # full-width compute and the store below is an unmasked, lane-dense vst.
    y = jnp.dot(h, w2_ref[...], preferred_element_type=jnp.float32)
    y = jax.nn.sigmoid(y + b2_ref[...].astype(jnp.float32))
    o_ref[...] = y.astype(o_ref.dtype)


def controller_forward(x, last_read, params):
    """Single-step forward, matching Controller.forward exactly.

    x: (B, Dx), last_read: (B, Dr) -> (B, num_outputs).
    """
    w1, b1, w2, b2 = params["w1"], params["b1"], params["w2"], params["b2"]
    num_outputs = params["num_outputs"]

    B = x.shape[0]
    din, H = w1.shape
    no_pad = w2.shape[1]

    # Fill whole sublanes; this is a no-op (no extra XLA pad op) when B is
    # already a multiple of 8, which is the steady-state calling convention.
    b_pad = _round_up(B, _SUBLANE)
    if b_pad != B:
        x = jnp.pad(x, ((0, b_pad - B), (0, 0)))
        last_read = jnp.pad(last_read, ((0, b_pad - B), (0, 0)))

    operands = (x, last_read, w1, b1, w2, b2)
    itemsize = x.dtype.itemsize
    bytes_accessed = sum(int(a.size) * a.dtype.itemsize for a in operands)
    bytes_accessed += b_pad * no_pad * itemsize
    cost = pl.CostEstimate(
        flops=2 * b_pad * (din * H + H * no_pad),
        transcendentals=b_pad * (H + no_pad),
        bytes_accessed=int(bytes_accessed),
    )

    out = pl.pallas_call(
        _controller_kernel,
        out_shape=jax.ShapeDtypeStruct((b_pad, no_pad), x.dtype),
        # Single-block kernel: whole-array VMEM residency, no index_map plumbing.
        in_specs=[pl.BlockSpec(memory_space=pltpu.MemorySpace.VMEM)] * len(operands),
        out_specs=pl.BlockSpec(memory_space=pltpu.MemorySpace.VMEM),
        scratch_shapes=[pltpu.VMEM((b_pad, din), x.dtype)],
        cost_estimate=cost,
    )(*operands)
    return out[:B, :num_outputs]


def controller_forward_seq(xs, last_reads, params, *, slice_output=True):
    """Many-step forward: xs (T, B, Dx), last_reads (T, B, Dr) -> (T, B, No).

    The timestep axis is a grid axis; the weight BlockSpecs' index_maps return
    (0, 0) for every step, so w1/b1/w2/b2 are DMA'd once and stay VMEM-resident
    across all T steps (no per-step launch overhead / per-step weight DMA).
    Steps are independent here because last_read is supplied as an input, so
    the axis is marked "parallel" (shards across both TensorCores on v7x).
    """
    w1, b1, w2, b2 = params["w1"], params["b1"], params["w2"], params["b2"]
    num_outputs = params["num_outputs"]

    T, B, dx = xs.shape
    dr = last_reads.shape[-1]
    din, H = w1.shape
    no_pad = w2.shape[1]

    b_pad = _round_up(B, _SUBLANE)
    if b_pad != B:  # once per sequence, not per step
        xs = jnp.pad(xs, ((0, 0), (0, b_pad - B), (0, 0)))
        last_reads = jnp.pad(last_reads, ((0, 0), (0, b_pad - B), (0, 0)))

    itemsize = xs.dtype.itemsize
    bytes_accessed = (int(xs.size) + int(last_reads.size)) * itemsize
    bytes_accessed += sum(int(a.size) * a.dtype.itemsize for a in (w1, b1, w2, b2))
    bytes_accessed += T * b_pad * no_pad * itemsize
    cost = pl.CostEstimate(
        flops=2 * T * b_pad * (din * H + H * no_pad),
        transcendentals=T * b_pad * (H + no_pad),
        bytes_accessed=int(bytes_accessed),
    )

    out = pl.pallas_call(
        _controller_kernel,
        out_shape=jax.ShapeDtypeStruct((T, b_pad, no_pad), xs.dtype),
        grid=(T,),
        in_specs=[
            pl.BlockSpec((None, b_pad, dx), lambda t: (t, 0, 0)),
            pl.BlockSpec((None, b_pad, dr), lambda t: (t, 0, 0)),
            pl.BlockSpec(w1.shape, lambda t: (0, 0)),   # weights: constant index
            pl.BlockSpec(b1.shape, lambda t: (0, 0)),   # -> DMA'd once, stay
            pl.BlockSpec(w2.shape, lambda t: (0, 0)),   #    VMEM-resident
            pl.BlockSpec(b2.shape, lambda t: (0, 0)),
        ],
        out_specs=pl.BlockSpec((None, b_pad, no_pad), lambda t: (t, 0, 0)),
        scratch_shapes=[pltpu.VMEM((b_pad, din), xs.dtype)],
        compiler_params=pltpu.CompilerParams(
            dimension_semantics=("parallel",)),
        cost_estimate=cost,
    )(xs, last_reads, w1, b1, w2, b2)
    # TODO(synk): the full win is fusing the whole NTM cell (heads + memory
    # update) with the time axis marked "arbitrary" and last_read/memory
    # carried in VMEM scratch; the memory module is outside this Controller
    # spec, so only the independent-step gridded form is implemented here.
    if slice_output:
        out = out[:, :B, :num_outputs]
    return out


def init_controller_params(key, dx, dr, num_outputs, num_hiddens,
                           dtype=jnp.float32):
    """Matches Controller.reset_parameters(): xavier_uniform_(gain=1.4) for
    weights, normal_(std=0.01) for biases.  Weights are stored transposed
    (in, out); W2 / b2 are zero-padded along the output axis to a multiple of
    128 lanes ONCE here (not per call) so the kernel's output store is
    lane-dense."""
    num_inputs = dx + dr
    k1, k2, k3, k4 = jax.random.split(key, 4)

    def xavier_uniform(k, fan_in, fan_out, gain):
        bound = gain * math.sqrt(6.0 / (fan_in + fan_out))
        return jax.random.uniform(k, (fan_in, fan_out), dtype,
                                  minval=-bound, maxval=bound)

    w1 = xavier_uniform(k1, num_inputs, num_hiddens, 1.4)        # (Din, H)
    b1 = (0.01 * jax.random.normal(k2, (1, num_hiddens))).astype(dtype)
    w2 = xavier_uniform(k3, num_hiddens, num_outputs, 1.4)       # (H, No)
    b2 = (0.01 * jax.random.normal(k4, (1, num_outputs))).astype(dtype)

    no_pad = _round_up(num_outputs, _LANE)
    w2_p = jnp.zeros((num_hiddens, no_pad), dtype).at[:, :num_outputs].set(w2)
    b2_p = jnp.zeros((1, no_pad), dtype).at[:, :num_outputs].set(b2)

    return {
        "w1": w1,                 # (Dx+Dr, H), un-split
        "b1": b1,                 # (1, H)
        "w2": w2_p,               # (H, No_pad), zero-padded columns
        "b2": b2_p,               # (1, No_pad)
        "num_outputs": num_outputs,
    }


def _reference_forward(x, last_read, params):
    xin = jnp.concatenate([x, last_read], axis=1)
    no = params["num_outputs"]
    h = jax.nn.sigmoid(xin @ params["w1"] + params["b1"])
    return jax.nn.sigmoid(h @ params["w2"][:, :no] + params["b2"][:, :no])


if __name__ == "__main__":
    # Shapes consistent with the module's forward: x (B, Dx), last_read (B, Dr),
    # num_inputs = Dx + Dr.  B=8 fills all sublanes of the activation vregs.
    B, Dx, Dr = 8, 24, 8
    num_hiddens, num_outputs = 32, 16
    T = 4

    key = jax.random.PRNGKey(0)
    kp, kx, kr, kxs, krs = jax.random.split(key, 5)

    params = init_controller_params(kp, Dx, Dr, num_outputs, num_hiddens)

    # --- single step (exact Controller.forward semantics) ---
    x = jax.random.normal(kx, (B, Dx), jnp.float32)
    last_read = jax.random.normal(kr, (B, Dr), jnp.float32)

    out = jax.block_until_ready(controller_forward(x, last_read, params))
    ref = _reference_forward(x, last_read, params)
    assert out.shape == (B, num_outputs)
    assert jnp.allclose(out, ref, atol=1e-5, rtol=1e-5)

    # --- T steps gridded in one pallas_call (weights stay VMEM-resident) ---
    xs = jax.random.normal(kxs, (T, B, Dx), jnp.float32)
    lrs = jax.random.normal(krs, (T, B, Dr), jnp.float32)

    outs = jax.block_until_ready(controller_forward_seq(xs, lrs, params))
    refs = jax.vmap(lambda a, b: _reference_forward(a, b, params))(xs, lrs)
    assert outs.shape == (T, B, num_outputs)
    assert jnp.allclose(outs, refs, atol=1e-5, rtol=1e-5)

    print("KERNEL_OK")
</pallas_src>

<mosaic_0001>
module attributes {stable_mosaic.version = 11 : i64} {
  func.func @_controller_kernel(%arg0: memref<8x24xf32, #tpu.memory_space<vmem>>, %arg1: memref<8x8xf32, #tpu.memory_space<vmem>>, %arg2: memref<32x32xf32, #tpu.memory_space<vmem>>, %arg3: memref<1x32xf32, #tpu.memory_space<vmem>>, %arg4: memref<32x128xf32, #tpu.memory_space<vmem>>, %arg5: memref<1x128xf32, #tpu.memory_space<vmem>>, %arg6: memref<8x128xf32, #tpu.memory_space<vmem>>, %arg7: memref<8x32xf32, #tpu.memory_space<vmem>>) attributes {dimension_semantics = [], scalar_prefetch = 0 : i64, scratch_operands = 1 : i64, tpu.core_type = #tpu.core_type<tc>} {
    %c0 = arith.constant 0 : index
    %c0_0 = arith.constant 0 : index
    %0 = vector.load %arg0[%c0, %c0_0] : memref<8x24xf32, #tpu.memory_space<vmem>>, vector<8x24xf32>
    %c0_1 = arith.constant 0 : index
    %c0_2 = arith.constant 0 : index
    %1 = vector.load %arg7[%c0_1, %c0_2] : memref<8x32xf32, #tpu.memory_space<vmem>>, vector<8x24xf32>
    tpu.vector_store %arg7[%c0_1, %c0_2], %0 {strides = array<i32>} : memref<8x32xf32, #tpu.memory_space<vmem>>, vector<8x24xf32>,
    %c0_3 = arith.constant 0 : index
    %c0_4 = arith.constant 0 : index
    %2 = vector.load %arg1[%c0_3, %c0_4] : memref<8x8xf32, #tpu.memory_space<vmem>>, vector<8x8xf32>
    %c0_5 = arith.constant 0 : index
    %c24 = arith.constant 24 : index
    %3 = vector.load %arg7[%c0_5, %c24] : memref<8x32xf32, #tpu.memory_space<vmem>>, vector<8x8xf32>
    tpu.vector_store %arg7[%c0_5, %c24], %2 {strides = array<i32>} : memref<8x32xf32, #tpu.memory_space<vmem>>, vector<8x8xf32>,
    %c0_6 = arith.constant 0 : index
    %c0_7 = arith.constant 0 : index
    %4 = vector.load %arg7[%c0_6, %c0_7] : memref<8x32xf32, #tpu.memory_space<vmem>>, vector<8x32xf32>
    %c0_8 = arith.constant 0 : index
    %c0_9 = arith.constant 0 : index
    %5 = vector.load %arg2[%c0_8, %c0_9] : memref<32x32xf32, #tpu.memory_space<vmem>>, vector<32x32xf32>
    %cst = arith.constant dense<0.000000e+00> : vector<8x32xf32>
    %6 = tpu.matmul %4, %5, %cst {dimension_numbers = #tpu.dot_dimension_numbers<[1], [0], [0], [1], [0, 0, 1, 1], [], []>} : vector<8x32xf32>, vector<32x32xf32>, vector<8x32xf32> -> vector<8x32xf32>
    %c0_10 = arith.constant 0 : index
    %c0_11 = arith.constant 0 : index
    %7 = vector.load %arg3[%c0_10, %c0_11] : memref<1x32xf32, #tpu.memory_space<vmem>>, vector<1x32xf32>
    %8 = vector.broadcast %7 : vector<1x32xf32> to vector<8x32xf32>
    %9 = arith.addf %6, %8 : vector<8x32xf32>
    %10 = arith.negf %9 : vector<8x32xf32>
    %11 = math.exp %10 : vector<8x32xf32>
    %cst_12 = arith.constant 1.000000e+00 : f32
    %12 = vector.broadcast %cst_12 : f32 to vector<8x32xf32>
    %13 = arith.addf %12, %11 : vector<8x32xf32>
    %14 = arith.divf %12, %13 : vector<8x32xf32>
    %c0_13 = arith.constant 0 : index
    %c0_14 = arith.constant 0 : index
    %15 = vector.load %arg4[%c0_13, %c0_14] : memref<32x128xf32, #tpu.memory_space<vmem>>, vector<32x128xf32>
    %cst_15 = arith.constant dense<0.000000e+00> : vector<8x128xf32>
    %16 = tpu.matmul %14, %15, %cst_15 {dimension_numbers = #tpu.dot_dimension_numbers<[1], [0], [0], [1], [0, 0, 1, 1], [], []>} : vector<8x32xf32>, vector<32x128xf32>, vector<8x128xf32> -> vector<8x128xf32>
    %c0_16 = arith.constant 0 : index
    %c0_17 = arith.constant 0 : index
    %17 = vector.load %arg5[%c0_16, %c0_17] : memref<1x128xf32, #tpu.memory_space<vmem>>, vector<1x128xf32>
    %18 = vector.broadcast %17 : vector<1x128xf32> to vector<8x128xf32>
    %19 = arith.addf %16, %18 : vector<8x128xf32>
    %20 = arith.negf %19 : vector<8x128xf32>
    %21 = math.exp %20 : vector<8x128xf32>
    %cst_18 = arith.constant 1.000000e+00 : f32
    %22 = vector.broadcast %cst_18 : f32 to vector<8x128xf32>
    %23 = arith.addf %22, %21 : vector<8x128xf32>
    %24 = arith.divf %22, %23 : vector<8x128xf32>
    %c0_19 = arith.constant 0 : index
    %c0_20 = arith.constant 0 : index
    %25 = vector.load %arg6[%c0_19, %c0_20] : memref<8x128xf32, #tpu.memory_space<vmem>>, vector<8x128xf32>
    tpu.vector_store %arg6[%c0_19, %c0_20], %24 {strides = array<i32>} : memref<8x128xf32, #tpu.memory_space<vmem>>, vector<8x128xf32>,
    return
  }
}

</mosaic_0001>

<bundles_post_ra>
// kernel: tpu_custom_call.1
= control target key start
LH: loop header
LB: loop body
LE: loop exit
PB: predicated region body
PF: predicated region fallthrough
CT: control target
= control target key end

     0   :  { %11 = vsyncpa [#allocation4], 0  ;;  %s586_s0 = inlined_call_operand.hbm [shape: f32[8,24], index: 0, kind: input, shape index: {}]   ;;  %s587_s1 = inlined_call_operand.hbm [shape: f32[8,8], index: 1, kind: input, shape index: {}]   ;;  %s588_s2 = inlined_call_operand.hbm [shape: f32[32,32], index: 2, kind: input, shape index: {}]   ;;  %s589_s3 = inlined_call_operand.vmem [shape: f32[1,32], index: 3, kind: input, shape index: {}]   ;;  %s590_s4 = inlined_call_operand.hbm [shape: f32[32,128], index: 4, kind: input, shape index: {}]   ;;  %s591_s5 = inlined_call_operand.vmem [shape: f32[1,128], index: 5, kind: input, shape index: {}]   ;;  %s592_s6 = inlined_call_operand.hbm [shape: f32[8,128], index: 6, kind: output, shape index: {}]  }
   0x1   :  { %12 = vsyncpa [#allocation7], 0 }
   0x2   :  { %13 = vsyncpa [#allocation10], 0 }
   0x3   :  { %14 = vsyncpa [#allocation5], 0  ;;  %s472_s21 = smov [#allocation6]   ;;  %s473_s23 = smov [#allocation3]  }
   0x4   :  { %s31_s22 = sshll.u32 %s472_s21, 4  ;;  %s21_s24 = sshll.u32 %s473_s23, 4  ;;  %s32_s22 = int_to_ptr.vmem [resolvable:$true] %s31_s22  ;;  %s22_s24 = int_to_ptr.vmem [resolvable:$true] %s21_s24 }
   0x5   :  { %s354_s27 = scalar_lea.hbm %s587_s1, 128 }
   0x6   :  { %p355_p0 = scmp.ne.s32.totalorder %s587_s1, %s354_s27  ;;  %p358_p1 = scmp.lt.u32.totalorder %s354_s27, %s587_s1 }
   0x8   :  { %p360_p2 = pnand %p358_p1, %p355_p0 }
   0xa   :  { %363 = shalt.err (!%p360_p2)
}
   0xb   :  { %s364_s8 = scalar_lea.vmem %s32_s22, 128  ;;  %p369_p4 = scmp.lt.s32.totalorder %s32_s22, %s32_s22 }
   0xc   :  { %p365_p3 = scmp.ne.s32.totalorder %s32_s22, %s364_s8  ;;  %p370_p5 = scmp.lt.s32.totalorder %s364_s8, %s364_s8 }
   0xe   :  { %p371_p6 = por %p370_p5, %p369_p4 }
  0x10   :  { %p372_p7 = pnand %p371_p6, %p365_p3 }
  0x12   :  { %375 = shalt.err (!%p372_p7)
}
  0x13   :  { %34 = dma.hbm_to_vmem [thread:$0]  %s587_s1, 128, %s32_s22, [#allocation7]  }
  0x14   :  { %s376_s13 = scalar_lea.hbm %s586_s0, 128 }
  0x15   :  { %p377_p8 = scmp.ne.s32.totalorder %s586_s0, %s376_s13  ;;  %p380_p9 = scmp.lt.u32.totalorder %s376_s13, %s586_s0 }
  0x17   :  { %p382_p10 = pnand %p380_p9, %p377_p8 }
  0x19   :  { %385 = shalt.err (!%p382_p10)
}
  0x1a   :  { %s386_s18 = scalar_lea.vmem %s22_s24, 128  ;;  %p391_p12 = scmp.lt.s32.totalorder %s22_s24, %s22_s24 }
  0x1b   :  { %p387_p11 = scmp.ne.s32.totalorder %s22_s24, %s386_s18  ;;  %p392_p13 = scmp.lt.s32.totalorder %s386_s18, %s386_s18 }
  0x1d   :  { %p393_p0 = por %p392_p13, %p391_p12 }
  0x1f   :  { %p394_p1 = pnand %p393_p0, %p387_p11 }
  0x21   :  { %397 = shalt.err (!%p394_p1)
}
  0x22   :  { %24 = dma.hbm_to_vmem [thread:$0]  %s586_s0, 128, %s22_s24, [#allocation4]  }
  0x23   :  { %s474_s20 = smov [#allocation8]   ;;  %s398_s25 = scalar_lea.hbm %s588_s2, 512 }
  0x24   :  { %s40_s21 = sshll.u32 %s474_s20, 4  ;;  %p399_p2 = scmp.ne.s32.totalorder %s588_s2, %s398_s25  ;;  %s41_s21 = int_to_ptr.vmem [resolvable:$true] %s40_s21 }
  0x25   :  { %p402_p3 = scmp.lt.u32.totalorder %s398_s25, %s588_s2 }
  0x27   :  { %p404_p4 = pnand %p402_p3, %p399_p2 }
  0x29   :  { %407 = shalt.err (!%p404_p4)
}
  0x2a   :  { %s408_s30 = scalar_lea.vmem %s41_s21, 512  ;;  %p413_p6 = scmp.lt.s32.totalorder %s41_s21, %s41_s21 }
  0x2b   :  { %p409_p5 = scmp.ne.s32.totalorder %s41_s21, %s408_s30  ;;  %p414_p7 = scmp.lt.s32.totalorder %s408_s30, %s408_s30 }
  0x2d   :  { %p415_p8 = por %p414_p7, %p413_p6 }
  0x2f   :  { %p416_p9 = pnand %p415_p8, %p409_p5 }
  0x31   :  { %419 = shalt.err (!%p416_p9)
}
  0x32   :  { %s475_s0 = smov 128   ;;  %s476_s24 = smov 8  }
  0x33   :  { %46 = dma.hbm_to_vmem [thread:$0]  %s588_s2, 512, %s41_s21, [#allocation7], %s475_s0, %s475_s0, %s476_s24  }
  0x34   :  { %s477_s9 = smov [#allocation9]   ;;  %s420_s13 = scalar_lea.hbm %s590_s4, 512 }
  0x35   :  { %s54_s10 = sshll.u32 %s477_s9, 4  ;;  %p421_p10 = scmp.ne.s32.totalorder %s590_s4, %s420_s13  ;;  %s55_s10 = int_to_ptr.vmem [resolvable:$true] %s54_s10 }
  0x36   :  { %p424_p11 = scmp.lt.u32.totalorder %s420_s13, %s590_s4 }
  0x38   :  { %p426_p12 = pnand %p424_p11, %p421_p10 }
  0x3a   :  { %429 = shalt.err (!%p426_p12)
}
  0x3b   :  { %s430_s18 = scalar_lea.vmem %s55_s10, 512  ;;  %p435_p0 = scmp.lt.s32.totalorder %s55_s10, %s55_s10 }
  0x3c   :  { %p431_p13 = scmp.ne.s32.totalorder %s55_s10, %s430_s18  ;;  %p436_p1 = scmp.lt.s32.totalorder %s430_s18, %s430_s18 }
  0x3e   :  { %p437_p2 = por %p436_p1, %p435_p0 }
  0x40   :  { %p438_p3 = pnand %p437_p2, %p431_p13 }
  0x42   :  { %441 = shalt.err (!%p438_p3)
}
  0x43   :  { %60 = dma.hbm_to_vmem [thread:$0]  %s590_s4, 512, %s55_s10, [#allocation10], %s475_s0, %s475_s0, %s476_s24  }
  0x44   :  { %464 = dma.done.wait [#allocation4], 128  }
  0x45   :  { %465 = vsyncadd [#allocation4], 4294967168 }
  0x46   :  { %466 = dma.done.wait [#allocation7], 640  }
  0x47   :  { %467 = vsyncadd [#allocation7], 4294966656 }
  0x48   :  { %468 = dma.done.wait [#allocation10], 512  }
  0x49   :  { %469 = vsyncadd [#allocation10], 4294966784  ;;  %v478_v0 = vmov 0.0|0.0   ;;  %vm479_vm0 = vmmov 0   ;;  %v480_v1 = vmov 0.0   ;;  %vm76_vm1 = vcmask 195584  }
  0x4a   :  { %323 = vmatprep.subr.bf16.mxu0 %v478_v0  ;;  %329 = vmatprep.subr.bf16.mxu1 %v478_v0  ;;  %v78_v2 = vld [vmem:[#allocation6] sm:$0xff]  ;;  %v75_v3 = vld [vmem:[#allocation3] sm:$0xff]  ;;  %v86_v4 = vld [vmem:[#allocation8] sm:$0xff]  ;;  %s481_s19 = smov 24   ;;  %vm83_vm2 = vcmask 261312   ;;  %vm97_vm3 = vcmask 261120  }
  0x4b   :  { %309 = vmatprep.mubr.msk.f32.mxu0 %vm479_vm0, %v480_v1  ;;  %320 = vmatprep.mubr.msk.f32.mxu1 %vm479_vm0, %v480_v1  ;;  %77 = vst.msk [vmem:[#allocation2] sm:$0xff] %vm76_vm1, %v75_v3  ;;  %v87_v5 = vld [vmem:[#allocation8 + $0x8] sm:$0xff]  ;;  %v88_v6 = vld [vmem:[#allocation8 + $0x10] sm:$0xff]  ;;  %v89_v7 = vld [vmem:[#allocation8 + $0x18] sm:$0xff] }
  0x4c   :  { %80 = vrot.lane.b32.xlu0 %v78_v2, %s481_s19  ;;  %v324_v8 = vpack.c.bf16 %v87_v5, %v86_v4  ;;  %v327_v9 = vpack.c.bf16 %v89_v7, %v88_v6  ;;  %v177_v12 = vld [vmem:[#allocation9] sm:$0xff]  ;;  %v178_v13 = vld [vmem:[#allocation9 + $0x8] sm:$0xff]  ;;  %v179_v14 = vld [vmem:[#allocation9 + $0x10] sm:$0xff] }
  0x4d   :  { %v330_v15 = vpack.c.bf16 %v178_v13, %v177_v12  ;;  %v180_v16 = vld [vmem:[#allocation9 + $0x18] sm:$0xff]  ;;  %v285_v18 = vld [vmem:[%s589_s3] ss:$0 sm:$0xff]  ;;  %s482_s3 = smov [#allocation11]  }
  0x4e   :  { %325 = vmatpush3.bf16.msra.mxu0 %v324_v8  ;;  %v333_v17 = vpack.c.bf16 %v180_v16, %v179_v14  ;;  %v288_v26 = vld [vmem:[%s591_s5] ss:$0 sm:$0xff]  ;;  %s274_s23 = sshll.u32 %s482_s3, 4  ;;  %s275_s23 = int_to_ptr.vmem [resolvable:$true] %s274_s23 }
  0x4f   :  { %326 = vmatprep.subr.bf16.mxu0 %v478_v0  ;;  %331 = vmatpush3.bf16.msra.mxu1 %v330_v15  ;;  %s442_s25 = scalar_lea.vmem %s275_s23, 128  ;;  %p447_p5 = scmp.lt.s32.totalorder %s275_s23, %s275_s23 }
  0x50   :  { %332 = vmatprep.subr.bf16.mxu1 %v478_v0  ;;  %p443_p4 = scmp.ne.s32.totalorder %s275_s23, %s442_s25  ;;  %p448_p6 = scmp.lt.s32.totalorder %s442_s25, %s442_s25 }
  0x52   :  { %328 = vmatpush3.bf16.msra.mxu0 %v327_v9  ;;  %p449_p7 = por %p448_p6, %p447_p5 }
  0x53   :  { %334 = vmatpush3.bf16.msra.mxu1 %v333_v17 }
  0x54   :  { %p450_p8 = pnand %p449_p7, %p443_p4 }
  0xbe   :  { %v81_v10 = vpop.permute.xlu0 %80 }
  0xbf   :  { %84 = vst.msk [vmem:[#allocation2] sm:$0xff] %vm83_vm2, %v81_v10 }
  0xc6   :  { %v85_v11 = vld [vmem:[#allocation2] sm:$0xff] }
  0xc7   :  { %310 = vmatmul.mubr.msk.f32.vlgmr.msra.gmra.mrb[0].mxu0 %vm97_vm3, %v85_v11 }
 0x19a   :  { %v167_v19 = vpop.f32.mrb[0].mxu0 }
 0x19b   :  { %v168_v20 = vadd.f32 %v285_v18, %v167_v19  ;;  %v311_v21 = vpop.f32.mrb[1].mxu0 }
 0x19d   :  { %v287_v22 = vmul.f32 -1.442695, %v168_v20 }
 0x19f   :  { %346 = vpow2.f32 %v287_v22 }
 0x1a9   :  { %v347_v23 = vpop.eup %346 }
 0x1aa   :  { %v174_v24 = vadd.f32 1.0, %v347_v23 }
 0x1ac   :  { %348 = vrcp.f32 %v174_v24 }
 0x1b6   :  { %v349_v25 = vpop.eup %348 }
 0x1b7   :  { %321 = vmatmul.mubr.msk.f32.vlgmr.msra.gmra.mrb[0].mxu1 %vm97_vm3, %v349_v25 }
 0x28a   :  { %v257_v27 = vpop.f32.mrb[0].mxu1 }
 0x28b   :  { %v258_v28 = vadd.f32 %v288_v26, %v257_v27  ;;  %v322_v29 = vpop.f32.mrb[1].mxu1 }
 0x28d   :  { %v290_v30 = vmul.f32 -1.442695, %v258_v28 }
 0x28f   :  { %350 = vpow2.f32 %v290_v30 }
 0x299   :  { %v351_v31 = vpop.eup %350 }
 0x29a   :  { %v264_v32 = vadd.f32 1.0, %v351_v31 }
 0x29c   :  { %352 = vrcp.f32 %v264_v32 }
 0x2a6   :  { %v353_v33 = vpop.eup %352 }
 0x2a7   :  { %267 = vst [vmem:[#allocation11] sm:$0xff] %v353_v33 }
 0x2a8   :  { %453 = shalt.err (!%p450_p8)
}
 0x2a9   :  { %s454_s27 = scalar_lea.hbm %s592_s6, 128 }
 0x2aa   :  { %p455_p9 = scmp.ne.s32.totalorder %s592_s6, %s454_s27  ;;  %p458_p10 = scmp.lt.u32.totalorder %s454_s27, %s592_s6 }
 0x2ac   :  { %p460_p11 = pnand %p458_p10, %p455_p9 }
 0x2ae   :  { %463 = shalt.err (!%p460_p11)
}
 0x2af   :  { %277 = dma.vmem_to_hbm [thread:$0]  %s275_s23, 128, %s592_s6, [#allocation5]  }
 0x2b0   :  { %470 = dma.done.wait [#allocation5], 128  }
 0x2b1   :  { %471 = vsyncadd [#allocation5], 4294967168 }
 0x2b2   :  { %281 = vsyncpa [#allocation4], 1 }
 0x2b3   :  { %282 = vsyncpa [#allocation7], 1 }
 0x2b4   :  { %283 = vsyncpa [#allocation10], 1 }
 0x2b5   :  { %284 = vsyncpa [#allocation5], 1 }

</bundles_post_ra>
